<compile_context>
chip_gen: v7x
topology: tpu7x:2x2x1
jax: 0.10.0
libtpu: 0.0.40
codegen_flags: <defaults>
</compile_context>

<pallas_src>
import functools

import jax
import jax.numpy as jnp
from jax.experimental import pallas as pl
from jax.experimental.pallas import tpu as pltpu


def _round_up(x: int, m: int) -> int:
    return ((x + m - 1) // m) * m


def make_mlp_kernel(num_layers: int, compute_dtype):
    """Fused MLP kernel: chain of (matmul + bias [+ ReLU]) on one row tile."""

    def kernel(*refs):
        # refs = [x_ref, w0_ref, b0_ref, w1_ref, b1_ref, ..., o_ref]
        x_ref = refs[0]
        o_ref = refs[-1]
        h = x_ref[...]
        for li in range(num_layers):
            w_ref = refs[1 + 2 * li]
            b_ref = refs[2 + 2 * li]
            # MXU matmul: operands in compute_dtype (bf16 fast path), f32 acc.
            h = jnp.dot(h.astype(compute_dtype), w_ref[...],
                        preferred_element_type=jnp.float32)
            h = h + b_ref[...]           # bias (1, D_out) broadcasts over rows (f32)
            if li < num_layers - 1:
                h = jnp.maximum(h, 0.0)  # ReLU between hidden layers (f32)
        o_ref[...] = h.astype(o_ref.dtype)

    return kernel


def decoder_sentinel_mono(x, weights, biases, *, tm: int = 1024,
                          use_bf16_matmul: bool = True):
    """Apply the decoder MLP to x[..., embed_dim] -> out[..., in_channels].

    weights[i] is stored (in_features, out_features) (transpose of torch layout)
    so the kernel computes h @ W + b directly.
    """
    orig_shape = x.shape
    d_in = orig_shape[-1]
    x2 = x.reshape(-1, d_in)
    m = x2.shape[0]
    num_layers = len(weights)
    d_out = weights[-1].shape[1]

    compute_dtype = jnp.bfloat16 if use_bf16_matmul else jnp.float32
    w_bytes_per_elem = 2 if use_bf16_matmul else 4

    # Row tiling: single block if everything fits, else big tiles + row padding.
    if m <= tm:
        tm_eff = max(8, _round_up(m, 8))
    else:
        tm_eff = max(8, _round_up(tm, 8))
    m_pad = _round_up(m, tm_eff)
    if m_pad != m:
        x2 = jnp.pad(x2, ((0, m_pad - m), (0, 0)))
    grid = (m_pad // tm_eff,)

    # x is tiled over rows; weights / biases are resident (same block every step).
    in_specs = [pl.BlockSpec((tm_eff, d_in), lambda i: (i, 0))]
    args = [x2]
    for w, b in zip(weights, biases):
        in_specs.append(pl.BlockSpec(w.shape, lambda i: (0, 0)))
        in_specs.append(pl.BlockSpec((1, b.shape[-1]), lambda i: (0, 0)))
        args.append(w.astype(compute_dtype))               # MXU operand dtype
        args.append(b.reshape(1, -1).astype(jnp.float32))  # bias stays f32
    out_spec = pl.BlockSpec((tm_eff, d_out), lambda i: (i, 0))

    # Advisory cost estimate for XLA's scheduler.
    dims = [d_in] + [w.shape[1] for w in weights]
    flops = 2 * m * sum(dims[i] * dims[i + 1] for i in range(len(dims) - 1))
    bytes_accessed = (
        m_pad * d_in * x2.dtype.itemsize
        + m_pad * d_out * jnp.dtype(x.dtype).itemsize
        + sum(int(w.size) * w_bytes_per_elem for w in weights)
        + sum(int(b.size) * 4 for b in biases))
    cost = pl.CostEstimate(flops=flops, transcendentals=0,
                           bytes_accessed=bytes_accessed)

    out = pl.pallas_call(
        make_mlp_kernel(num_layers, compute_dtype),
        out_shape=jax.ShapeDtypeStruct((m_pad, d_out), x.dtype),
        grid_spec=pltpu.PrefetchScalarGridSpec(
            num_scalar_prefetch=0,
            grid=grid,
            in_specs=in_specs,
            out_specs=out_spec,
        ),
        compiler_params=pltpu.CompilerParams(
            dimension_semantics=("parallel",)),  # row axis shards across v7x TCs
        cost_estimate=cost,
    )(*args)
    if m_pad != m:
        out = out[:m]
    return out.reshape(*orig_shape[:-1], d_out)


def init_decoder_params(key, in_channels, inter_dim, embed_dim):
    """Deterministic init matching the module's layer shapes.

    Mirrors torch.nn.Linear default init: U(-1/sqrt(fan_in), 1/sqrt(fan_in)).
    Weights stored as (in_features, out_features).
    """
    dims = [embed_dim] + list(inter_dim) + [in_channels]
    weights, biases = [], []
    for i in range(len(dims) - 1):
        fan_in, fan_out = dims[i], dims[i + 1]
        key, kw, kb = jax.random.split(key, 3)
        bound = 1.0 / (fan_in ** 0.5)
        w = jax.random.uniform(kw, (fan_in, fan_out), jnp.float32, -bound, bound)
        b = jax.random.uniform(kb, (fan_out,), jnp.float32, -bound, bound)
        weights.append(w)
        biases.append(b)
    return weights, biases


def decoder_reference(x, weights, biases):
    """Pure-JAX reference of the forward pass (f32 throughout)."""
    h = x
    n = len(weights)
    for i, (w, b) in enumerate(zip(weights, biases)):
        h = h @ w + b
        if i < n - 1:
            h = jnp.maximum(h, 0.0)
    return h


if __name__ == "__main__":
    key = jax.random.PRNGKey(0)
    in_channels = 10

    # --- Config A: module defaults (inter_dim=[], embed_dim=128): single Linear,
    #     no ReLU.  x: (batch=2, seq=8, 128) -> (2, 8, 10).
    embed_dim_a = 128
    key, kxa = jax.random.split(key)
    x_a = jax.random.normal(kxa, (2, 8, embed_dim_a), jnp.float32)
    key, ka = jax.random.split(key)
    w_a, b_a = init_decoder_params(ka, in_channels, [], embed_dim_a)
    ref_a = decoder_reference(x_a, w_a, b_a)

    run_a_f32 = jax.jit(functools.partial(decoder_sentinel_mono,
                                          use_bf16_matmul=False))
    out_a_f32 = jax.block_until_ready(run_a_f32(x_a, w_a, b_a))
    assert out_a_f32.shape == (2, 8, in_channels), out_a_f32.shape
    assert jnp.allclose(out_a_f32, ref_a, atol=1e-4, rtol=1e-4), "A f32 mismatch"

    run_a_bf16 = jax.jit(decoder_sentinel_mono)
    out_a_bf16 = jax.block_until_ready(run_a_bf16(x_a, w_a, b_a))
    assert out_a_bf16.shape == (2, 8, in_channels), out_a_bf16.shape
    assert jnp.allclose(out_a_bf16, ref_a, atol=5e-2, rtol=5e-2), "A bf16 mismatch"

    # --- Config B: hidden layer (inter_dim=[64], embed_dim=32): Linear-ReLU-Linear.
    #     x: (2, 8, 32) -> (2, 8, 10).  m=16 fits one block -> grid=(1,).
    embed_dim_b = 32
    inter_dim_b = [64]
    key, kxb = jax.random.split(key)
    x_b = jax.random.normal(kxb, (2, 8, embed_dim_b), jnp.float32)
    key, kb_ = jax.random.split(key)
    w_b, b_b = init_decoder_params(kb_, in_channels, inter_dim_b, embed_dim_b)
    ref_b = decoder_reference(x_b, w_b, b_b)

    run_b_f32 = jax.jit(functools.partial(decoder_sentinel_mono,
                                          use_bf16_matmul=False))
    out_b_f32 = jax.block_until_ready(run_b_f32(x_b, w_b, b_b))
    assert out_b_f32.shape == (2, 8, in_channels), out_b_f32.shape
    assert jnp.allclose(out_b_f32, ref_b, atol=1e-4, rtol=1e-4), "B f32 mismatch"

    run_b_bf16 = jax.jit(decoder_sentinel_mono)
    out_b_bf16 = jax.block_until_ready(run_b_bf16(x_b, w_b, b_b))
    assert out_b_bf16.shape == (2, 8, in_channels), out_b_bf16.shape
    assert jnp.allclose(out_b_bf16, ref_b, atol=5e-2, rtol=5e-2), "B bf16 mismatch"

    # --- Config C: multi-step grid + row padding: m=3*70=210 rows, tm=64 ->
    #     padded to 256 rows, grid=(4,); padded rows sliced off by the wrapper.
    key, kxc = jax.random.split(key)
    x_c = jax.random.normal(kxc, (3, 70, embed_dim_b), jnp.float32)
    run_c = jax.jit(functools.partial(decoder_sentinel_mono, tm=64,
                                      use_bf16_matmul=False))
    out_c = jax.block_until_ready(run_c(x_c, w_b, b_b))
    ref_c = decoder_reference(x_c, w_b, b_b)
    assert out_c.shape == (3, 70, in_channels), out_c.shape
    assert jnp.allclose(out_c, ref_c, atol=1e-4, rtol=1e-4), "C tiled mismatch"

    print("KERNEL_OK")
</pallas_src>

<mosaic_0001>
module attributes {stable_mosaic.version = 11 : i64} {
  func.func @kernel(%arg0: i32, %arg1: memref<16x128xf32, #tpu.memory_space<vmem>>, %arg2: memref<128x10xf32, #tpu.memory_space<vmem>>, %arg3: memref<1x10xf32, #tpu.memory_space<vmem>>, %arg4: memref<16x10xf32, #tpu.memory_space<vmem>>) attributes {dimension_semantics = [#tpu.dimension_semantics<parallel>], iteration_bounds = array<i64: 1>, scalar_prefetch = 0 : i64, scratch_operands = 0 : i64, tpu.core_type = #tpu.core_type<tc>, window_params = [{transform_indices = @transform_0, window_bounds = array<i64: 16, 128>}, {pipeline_mode = #tpu.pipeline_mode<synchronous>, transform_indices = @transform_1, window_bounds = array<i64: 128, 10>}, {pipeline_mode = #tpu.pipeline_mode<synchronous>, transform_indices = @transform_2, window_bounds = array<i64: 1, 10>}, {transform_indices = @transform_3, window_bounds = array<i64: 16, 10>}]} {
    %c0 = arith.constant 0 : index
    %c0_0 = arith.constant 0 : index
    %0 = vector.load %arg1[%c0, %c0_0] : memref<16x128xf32, #tpu.memory_space<vmem>>, vector<16x128xf32>
    %c0_1 = arith.constant 0 : index
    %c0_2 = arith.constant 0 : index
    %1 = vector.load %arg2[%c0_1, %c0_2] : memref<128x10xf32, #tpu.memory_space<vmem>>, vector<128x10xf32>
    %cst = arith.constant dense<0.000000e+00> : vector<16x10xf32>
    %2 = tpu.matmul %0, %1, %cst {dimension_numbers = #tpu.dot_dimension_numbers<[1], [0], [0], [1], [0, 0, 1, 1], [], []>} : vector<16x128xf32>, vector<128x10xf32>, vector<16x10xf32> -> vector<16x10xf32>
    %c0_3 = arith.constant 0 : index
    %c0_4 = arith.constant 0 : index
    %3 = vector.load %arg3[%c0_3, %c0_4] : memref<1x10xf32, #tpu.memory_space<vmem>>, vector<1x10xf32>
    %4 = vector.broadcast %3 : vector<1x10xf32> to vector<16x10xf32>
    %5 = arith.addf %2, %4 : vector<16x10xf32>
    %c0_5 = arith.constant 0 : index
    %c0_6 = arith.constant 0 : index
    %6 = vector.load %arg4[%c0_5, %c0_6] : memref<16x10xf32, #tpu.memory_space<vmem>>, vector<16x10xf32>
    tpu.vector_store %arg4[%c0_5, %c0_6], %5 {strides = array<i32>} : memref<16x10xf32, #tpu.memory_space<vmem>>, vector<16x10xf32>,
    return
  }
  func.func @transform_0(%arg0: i32) -> (i32, i32) {
    %c0_i32 = arith.constant 0 : i32
    %c0_i32_0 = arith.constant 0 : i32
    return %arg0, %c0_i32 : i32, i32
  }
  func.func @transform_1(%arg0: i32) -> (i32, i32) {
    %c0_i32 = arith.constant 0 : i32
    %c0_i32_0 = arith.constant 0 : i32
    %c0_i32_1 = arith.constant 0 : i32
    return %c0_i32, %c0_i32_0 : i32, i32
  }
  func.func @transform_2(%arg0: i32) -> (i32, i32) {
    %c0_i32 = arith.constant 0 : i32
    %c0_i32_0 = arith.constant 0 : i32
    %c0_i32_1 = arith.constant 0 : i32
    return %c0_i32, %c0_i32_0 : i32, i32
  }
  func.func @transform_3(%arg0: i32) -> (i32, i32) {
    %c0_i32 = arith.constant 0 : i32
    %c0_i32_0 = arith.constant 0 : i32
    return %arg0, %c0_i32 : i32, i32
  }
}

</mosaic_0001>

<bundles_post_ra>
// kernel: decoder_sentinel_mono.1
= control target key start
LH: loop header
LB: loop body
LE: loop exit
PB: predicated region body
PF: predicated region fallthrough
CT: control target
= control target key end

     0   :  { %s339_s0 = inlined_call_operand.vmem [shape: f32[16,128], index: 0, kind: input, shape index: {}]   ;;  %s340_s1 = inlined_call_operand.vmem [shape: f32[128,10], index: 1, kind: input, shape index: {}]   ;;  %s341_s2 = inlined_call_operand.vmem [shape: f32[1,10], index: 2, kind: input, shape index: {}]   ;;  %s342_s3 = inlined_call_operand.hbm [shape: f32[16,10], index: 3, kind: output, shape index: {}]  }
   0x1   :  { %v17_v0 = vld [vmem:[%s340_s1] sm:$0xff]  ;;  %v18_v1 = vld [vmem:[%s340_s1 + $0x8] sm:$0xff]  ;;  %v19_v2 = vld [vmem:[%s340_s1 + $0x10] sm:$0xff] }
   0x2   :  { %v188_v3 = vpack.c.bf16 %v18_v1, %v17_v0  ;;  %v20_v4 = vld [vmem:[%s340_s1 + $0x18] sm:$0xff]  ;;  %v21_v6 = vld [vmem:[%s340_s1 + $0x20] sm:$0xff]  ;;  %v22_v7 = vld [vmem:[%s340_s1 + $0x28] sm:$0xff] }
   0x3   :  { %v192_v5 = vpack.c.bf16 %v20_v4, %v19_v2  ;;  %v196_v8 = vpack.c.bf16 %v22_v7, %v21_v6  ;;  %v15_v9 = vld [vmem:[%s339_s0] sm:$0xff]  ;;  %v23_v10 = vld [vmem:[%s340_s1 + $0x30] sm:$0xff]  ;;  %v24_v11 = vld [vmem:[%s340_s1 + $0x38] sm:$0xff] }
   0x4   :  { %189 = vmatprep.subr.bf16.mxu0 %v188_v3  ;;  %185 = vmatprep.mubr.f32.mxu0 %v15_v9 }
   0x5   :  { %191 = vmatpush3.bf16.msra.mxu0 %v188_v3 }
   0x6   :  { %193 = vmatprep.subr.bf16.mxu0 %v192_v5 }
   0x7   :  { %8 = vsyncpa [#allocation3], 0  ;;  %v200_v12 = vpack.c.bf16 %v24_v11, %v23_v10  ;;  %v25_v13 = vld [vmem:[%s340_s1 + $0x40] sm:$0xff]  ;;  %v26_v14 = vld [vmem:[%s340_s1 + $0x48] sm:$0xff]  ;;  %s247_s23 = smov [#allocation2]   ;;  %vm115_vm0 = vcmask 80896  }
   0x8   :  { %v204_v15 = vpack.c.bf16 %v26_v14, %v25_v13  ;;  %v27_v16 = vld [vmem:[%s340_s1 + $0x50] sm:$0xff]  ;;  %v28_v17 = vld [vmem:[%s340_s1 + $0x58] sm:$0xff]  ;;  %v29_v19 = vld [vmem:[%s340_s1 + $0x60] sm:$0xff]  ;;  %s123_s24 = sshll.u32 %s247_s23, 4  ;;  %s124_s24 = int_to_ptr.vmem [resolvable:$true] %s123_s24 }
   0x9   :  { %195 = vmatpush3.bf16.msra.mxu0 %v192_v5  ;;  %v208_v18 = vpack.c.bf16 %v28_v17, %v27_v16  ;;  %v30_v20 = vld [vmem:[%s340_s1 + $0x68] sm:$0xff]  ;;  %v31_v22 = vld [vmem:[%s340_s1 + $0x70] sm:$0xff]  ;;  %v32_v23 = vld [vmem:[%s340_s1 + $0x78] sm:$0xff]  ;;  %s223_s1 = scalar_lea.vmem %s124_s24, 256  ;;  %p228_p1 = scmp.lt.s32.totalorder %s124_s24, %s124_s24 }
   0xa   :  { %197 = vmatprep.subr.bf16.mxu0 %v196_v8  ;;  %v212_v21 = vpack.c.bf16 %v30_v20, %v29_v19  ;;  %v216_v24 = vpack.c.bf16 %v32_v23, %v31_v22  ;;  %v16_v25 = vld [vmem:[%s339_s0 + $0x8] sm:$0xff]  ;;  %v134_v26 = vld [vmem:[%s341_s2] ss:$0 sm:$0xff]  ;;  %p224_p0 = scmp.ne.s32.totalorder %s124_s24, %s223_s1  ;;  %p229_p2 = scmp.lt.s32.totalorder %s223_s1, %s223_s1 }
   0xc   :  { %p230_p3 = por %p229_p2, %p228_p1 }
   0xd   :  { %199 = vmatpush3.bf16.msra.mxu0 %v196_v8 }
   0xe   :  { %201 = vmatprep.subr.bf16.mxu0 %v200_v12  ;;  %p231_p4 = pnand %p230_p3, %p224_p0 }
  0x11   :  { %203 = vmatpush3.bf16.msra.mxu0 %v200_v12 }
  0x12   :  { %205 = vmatprep.subr.bf16.mxu0 %v204_v15 }
  0x15   :  { %207 = vmatpush3.bf16.msra.mxu0 %v204_v15 }
  0x16   :  { %209 = vmatprep.subr.bf16.mxu0 %v208_v18 }
  0x19   :  { %211 = vmatpush3.bf16.msra.mxu0 %v208_v18 }
  0x1a   :  { %213 = vmatprep.subr.bf16.mxu0 %v212_v21 }
  0x1d   :  { %215 = vmatpush3.bf16.msra.mxu0 %v212_v21 }
  0x1e   :  { %217 = vmatprep.subr.bf16.mxu0 %v216_v24 }
  0x21   :  { %219 = vmatpush3.bf16.msra.mxu0 %v216_v24 }
  0x24   :  { %186 = vmatmul.mubr.f32.vlgmr.msra.gmra.mrb[0].mxu0 %v16_v25 }
  0xf7   :  { %v187_v27 = vpop.f32.mrb[0].mxu0 }
  0xf8   :  { %v112_v28 = vadd.f32 %v187_v27, %v134_v26  ;;  %v106_v29 = vpop.f32.mrb[1].mxu0 }
  0xf9   :  { %v107_v30 = vadd.f32 %v134_v26, %v106_v29 }
  0xfa   :  { %117 = vst.msk [vmem:[#allocation2 + $0x8] sm:$0xff] %vm115_vm0, %v112_v28 }
  0xfb   :  { %116 = vst.msk [vmem:[#allocation2] sm:$0xff] %vm115_vm0, %v107_v30 }
  0xfc   :  { %234 = shalt.err (!%p231_p4)
}
  0xfd   :  { %s235_s2 = scalar_lea.hbm %s342_s3, 256 }
  0xfe   :  { %p236_p5 = scmp.ne.s32.totalorder %s342_s3, %s235_s2  ;;  %p239_p6 = scmp.lt.u32.totalorder %s235_s2, %s342_s3 }
 0x100   :  { %p241_p7 = pnand %p239_p6, %p236_p5 }
 0x102   :  { %244 = shalt.err (!%p241_p7)
}
 0x103   :  { %s248_s30 = smov 128   ;;  %s249_s4 = smov 8  }
 0x104   :  { %129 = dma.vmem_to_hbm [thread:$0]  %s124_s24, 256, %s342_s3, [#allocation3], %s248_s30, %s248_s30, %s249_s4  }
 0x105   :  { %245 = dma.done.wait [#allocation3], 256  }
 0x106   :  { %246 = vsyncadd [#allocation3], 4294967040 }
 0x107   :  { %133 = vsyncpa [#allocation3], 1 }

</bundles_post_ra>
